<compile_context>
chip_gen: v7x
topology: tpu7x:2x2x1
jax: 0.10.0
libtpu: 0.0.40
codegen_flags: <defaults>
</compile_context>

<pallas_src>
import functools

import jax
import jax.numpy as jnp
from jax.experimental import pallas as pl
from jax.experimental.pallas import tpu as pltpu

_EPS = 1e-5
_SQRT_2_OVER_PI = 0.7978845608028654
_GELU_C = 0.044715


def _gelu_tanh(x):
    # tanh-approximate GELU (PyTorch nn.GELU(approximate='tanh')): ~7 VPU ops +
    # 1 EUP op per element.  Max abs deviation from erf-exact GELU ~3e-4.
    inner = _SQRT_2_OVER_PI * x * (1.0 + _GELU_C * (x * x))
    return 0.5 * x * (1.0 + jnp.tanh(inner))


def _ffn_kernel(x_ref, w1_ref, b1_ref, w2_ref, b2_ref, o_ref):
    # x_ref/o_ref: (C, bs) slabs (batch dim squeezed).  w1: (Hd, C) bf16 with the LN
    # gamma folded in, b1: (Hd, 1) in the epilogue dtype (already includes W1 @ beta).
    # w2: (C, Hd) bf16, b2: (C, 1) f32.
    x = x_ref[...].astype(jnp.float32)                     # no-op for f32 inputs

    # LayerNorm over the channel (sublane) axis, biased variance, eps inside rsqrt.
    mean = jnp.mean(x, axis=0, keepdims=True)              # (1, bs)
    xc = x - mean
    var = jnp.mean(xc * xc, axis=0, keepdims=True)
    xn = xc * jax.lax.rsqrt(var + _EPS)                    # affine folded into W1/b1

    # 1x1 conv #1 on the MXU: (Hd, C) @ (C, bs), bf16 inputs, f32 accumulate.
    h = jnp.dot(w1_ref[...], xn.astype(jnp.bfloat16),
                preferred_element_type=jnp.float32)

    # Bias + GELU epilogue in the epilogue dtype (bf16 on v6e/v7x, f32 on v5e).
    h = _gelu_tanh(h.astype(b1_ref.dtype) + b1_ref[...])

    # Dropout(p=0.0) == identity.
    # 1x1 conv #2 on the MXU: (C, Hd) @ (Hd, bs).
    y = jnp.dot(w2_ref[...], h.astype(jnp.bfloat16),
                preferred_element_type=jnp.float32)
    o_ref[...] = (y + b2_ref[...]).astype(o_ref.dtype)


def _epilogue_dtype_for_device():
    """bf16 epilogue on bf16-native VPU/EUP chips (v6e/v7x); f32 on v5e and older."""
    try:
        kind = jax.devices()[0].device_kind.lower()
    except Exception:
        return jnp.float32
    if any(tag in kind for tag in ("v2", "v3", "v4", "v5")):
        return jnp.float32
    return jnp.bfloat16


def _vmem_capacity_bytes():
    try:
        return int(pltpu.get_tpu_info().vmem_capacity_bytes)
    except Exception:
        return 64 * 2**20  # v7x per-TensorCore capacity (most conservative)


def _vmem_estimate(C, Hd, bs, in_itemsize, epi_itemsize):
    """Honest per-kernel VMEM estimate for a (C, bs) spatial slab."""
    io_blocks = 2 * (2 * C * bs * in_itemsize)        # double-buffered input + output
    weights = 2 * (2 * Hd * C * 2)                    # double-buffered bf16 W1 and W2
    biases = 2 * (Hd + C) * 4
    temps = (C * bs * (4 + 4 + 2)                     # x f32, xn f32, xn bf16
             + Hd * bs * (4 + 3 * epi_itemsize)       # h f32 + epilogue h / GELU temps
             + C * bs * 4)                            # y f32 before the output cast
    return io_blocks + weights + biases + temps


def prepare_ffn_params(ln_g, ln_b, w1, b1, w2, b2, epilogue_dtype=None):
    """One-time parameter prep (do NOT redo per call): fold the LayerNorm affine into
    the first 1x1 conv and cast the weights to bf16 for the MXU.

    w1: (Hd, C), w2: (C, Hd) are the PyTorch Conv2d 1x1 weights with (1,1) squeezed.
    """
    if epilogue_dtype is None:
        epilogue_dtype = _epilogue_dtype_for_device()
    C = w1.shape[1]
    Hd = w1.shape[0]
    w1f = w1.astype(jnp.float32) * ln_g.astype(jnp.float32)[None, :]
    b1f = b1.astype(jnp.float32) + w1.astype(jnp.float32) @ ln_b.astype(jnp.float32)
    return (w1f.astype(jnp.bfloat16),                       # (Hd, C) bf16
            b1f.reshape(Hd, 1).astype(epilogue_dtype),      # (Hd, 1) epilogue dtype
            w2.astype(jnp.bfloat16),                        # (C, Hd) bf16
            b2.reshape(C, 1).astype(jnp.float32))           # (C, 1) f32


@functools.partial(jax.jit, static_argnames=("block_s",))
def feed_forward(x, w1b, b1c, w2b, b2c, *, block_s=None):
    """Fused FeedForward: LayerNorm(channels) -> 1x1 conv -> GELU -> 1x1 conv.

    x: (B, C, H, W); remaining args come from prepare_ffn_params().
    """
    B, C, H, W = x.shape
    Hd = w1b.shape[0]
    S = H * W
    itemsize = x.dtype.itemsize
    epi_itemsize = jnp.dtype(b1c.dtype).itemsize

    vmem_cap = _vmem_capacity_bytes()
    budget = int(0.75 * vmem_cap)

    # ---- spatial tile selection (lane axis; multiples of 128 where possible) ----
    if block_s is None:
        if S <= 128:
            bs = S
        else:
            max_bs = min(2048, (S // 128) * 128)
            bs = 128
            for cand in range(128, max_bs + 1, 128):
                if _vmem_estimate(C, Hd, cand, itemsize, epi_itemsize) <= budget:
                    bs = cand
        # v7x has 2 TensorCores sharing the "parallel" axes; make sure batch=1
        # still yields >= 2 programs.
        if B == 1 and bs >= S and S >= 256:
            bs = max(128, (((S + 1) // 2 + 127) // 128) * 128)
    else:
        bs = min(block_s, S)
        if bs < S and bs % 128 != 0:
            bs = min(S, max(128, (bs // 128) * 128))

    grid = (B, pl.cdiv(S, bs))  # ragged last tile handled by masked edge writes

    est = _vmem_estimate(C, Hd, bs, itemsize, epi_itemsize)
    vmem_limit = int(min(max(int(1.5 * est), 16 * 2**20), int(0.85 * vmem_cap)))

    # Keep NCHW; flatten spatial onto the lane axis (contiguous reshape, free).
    x3 = x.reshape(B, C, S)

    out = pl.pallas_call(
        _ffn_kernel,
        out_shape=jax.ShapeDtypeStruct((B, C, S), x.dtype),
        grid_spec=pltpu.PrefetchScalarGridSpec(
            num_scalar_prefetch=0,
            grid=grid,
            in_specs=[
                pl.BlockSpec((None, C, bs), lambda i, j: (i, 0, j)),  # x slab (2D in kernel)
                pl.BlockSpec((Hd, C), lambda i, j: (0, 0)),           # W1 (bf16, LN folded)
                pl.BlockSpec((Hd, 1), lambda i, j: (0, 0)),           # b1 (epilogue dtype)
                pl.BlockSpec((C, Hd), lambda i, j: (0, 0)),           # W2 (bf16)
                pl.BlockSpec((C, 1), lambda i, j: (0, 0)),            # b2 (f32)
            ],
            out_specs=pl.BlockSpec((None, C, bs), lambda i, j: (i, 0, j)),
        ),
        compiler_params=pltpu.CompilerParams(
            # Both axes independent -> megacore / v7x dual-TC sharding.
            dimension_semantics=("parallel", "parallel"),
            vmem_limit_bytes=vmem_limit,
        ),
    )(x3, w1b, b1c, w2b, b2c)

    return out.reshape(B, C, H, W)


def _reference(x, ln_g, ln_b, w1, b1, w2, b2):
    """Plain-JAX reference with PyTorch semantics (f32 LayerNorm + affine, erf-exact
    GELU), using bf16 matmul inputs / f32 accumulation to mirror the kernel's MXU
    precision."""
    B, C, H, W = x.shape
    xf = x.reshape(B, C, H * W).astype(jnp.float32)
    mean = jnp.mean(xf, axis=1, keepdims=True)
    var = jnp.mean((xf - mean) ** 2, axis=1, keepdims=True)
    xn = (xf - mean) * jax.lax.rsqrt(var + _EPS)
    xn = xn * ln_g.reshape(1, C, 1) + ln_b.reshape(1, C, 1)
    h = jnp.einsum("oc,bcs->bos", w1.astype(jnp.bfloat16), xn.astype(jnp.bfloat16),
                   preferred_element_type=jnp.float32) + b1.reshape(1, -1, 1)
    h = jax.nn.gelu(h, approximate=False)
    y = jnp.einsum("co,bos->bcs", w2.astype(jnp.bfloat16), h.astype(jnp.bfloat16),
                   preferred_element_type=jnp.float32) + b2.reshape(1, C, 1)
    return y.reshape(B, C, H, W).astype(x.dtype)


if __name__ == "__main__":
    # Small shapes consistent with the module: dim=32, mult=4, 16x16 spatial, batch 2.
    B, dim, mult = 2, 32, 4
    H = W = 16
    Hd = dim * mult

    key = jax.random.PRNGKey(0)
    kx, kg, kb, kw1, kb1, kw2, kb2 = jax.random.split(key, 7)

    x = jax.random.normal(kx, (B, dim, H, W), dtype=jnp.float32)
    ln_g = 1.0 + 0.1 * jax.random.normal(kg, (dim,), dtype=jnp.float32)
    ln_b = 0.1 * jax.random.normal(kb, (dim,), dtype=jnp.float32)
    # PyTorch Conv2d 1x1 weights are (out, in, 1, 1); pass them squeezed to (out, in).
    w1 = 0.05 * jax.random.normal(kw1, (Hd, dim), dtype=jnp.float32)
    b1 = 0.02 * jax.random.normal(kb1, (Hd,), dtype=jnp.float32)
    w2 = 0.05 * jax.random.normal(kw2, (dim, Hd), dtype=jnp.float32)
    b2 = 0.02 * jax.random.normal(kb2, (dim,), dtype=jnp.float32)

    # One-time parameter prep (LN fold + bf16 weight cast), then the fused kernel.
    params = prepare_ffn_params(ln_g, ln_b, w1, b1, w2, b2)
    out = feed_forward(x, *params)
    out = jax.block_until_ready(out)

    ref = _reference(x, ln_g, ln_b, w1, b1, w2, b2)
    assert out.shape == (B, dim, H, W), out.shape
    max_err = float(jnp.max(jnp.abs(out - ref)))
    # Tolerance covers bf16 MXU inputs, the bf16 epilogue on v6e/v7x, and the
    # tanh-approximate GELU (~3e-4) vs the erf-exact reference.
    assert jnp.allclose(out, ref, atol=3e-3, rtol=3e-3), f"mismatch vs reference: {max_err}"

    print("KERNEL_OK")
</pallas_src>

<mosaic_0001>
module attributes {stable_mosaic.version = 11 : i64} {
  func.func @_ffn_kernel(%arg0: i32, %arg1: i32, %arg2: memref<1x32x256xf32, #tpu.memory_space<vmem>>, %arg3: memref<128x32xbf16, #tpu.memory_space<vmem>>, %arg4: memref<128x1xbf16, #tpu.memory_space<vmem>>, %arg5: memref<32x128xbf16, #tpu.memory_space<vmem>>, %arg6: memref<32x1xf32, #tpu.memory_space<vmem>>, %arg7: memref<1x32x256xf32, #tpu.memory_space<vmem>>) attributes {dimension_semantics = [#tpu.dimension_semantics<parallel>, #tpu.dimension_semantics<parallel>], iteration_bounds = array<i64: 2, 1>, scalar_prefetch = 0 : i64, scratch_operands = 0 : i64, tpu.core_type = #tpu.core_type<tc>, window_params = [{transform_indices = @transform_0, window_bounds = array<i64: 1, 32, 256>}, {pipeline_mode = #tpu.pipeline_mode<synchronous>, transform_indices = @transform_1, window_bounds = array<i64: 128, 32>}, {pipeline_mode = #tpu.pipeline_mode<synchronous>, transform_indices = @transform_2, window_bounds = array<i64: 128, 1>}, {pipeline_mode = #tpu.pipeline_mode<synchronous>, transform_indices = @transform_3, window_bounds = array<i64: 32, 128>}, {pipeline_mode = #tpu.pipeline_mode<synchronous>, transform_indices = @transform_4, window_bounds = array<i64: 32, 1>}, {transform_indices = @transform_5, window_bounds = array<i64: 1, 32, 256>}]} {
    %c0 = arith.constant 0 : index
    %c0_0 = arith.constant 0 : index
    %c0_1 = arith.constant 0 : index
    %0 = vector.load %arg2[%c0, %c0_0, %c0_1] : memref<1x32x256xf32, #tpu.memory_space<vmem>>, vector<1x32x256xf32>
    %1 = vector.shape_cast %0 : vector<1x32x256xf32> to vector<32x256xf32>
    %cst = arith.constant dense<0.000000e+00> : vector<256xf32>
    %2 = vector.multi_reduction <add>, %1, %cst [0] : vector<32x256xf32> to vector<256xf32>
    %3 = vector.shape_cast %2 : vector<256xf32> to vector<1x256xf32>
    %cst_2 = arith.constant 3.200000e+01 : f32
    %4 = vector.broadcast %cst_2 : f32 to vector<1x256xf32>
    %5 = arith.divf %3, %4 : vector<1x256xf32>
    %6 = vector.broadcast %5 : vector<1x256xf32> to vector<32x256xf32>
    %7 = arith.subf %1, %6 : vector<32x256xf32>
    %8 = arith.mulf %7, %7 : vector<32x256xf32>
    %cst_3 = arith.constant dense<0.000000e+00> : vector<256xf32>
    %9 = vector.multi_reduction <add>, %8, %cst_3 [0] : vector<32x256xf32> to vector<256xf32>
    %10 = vector.shape_cast %9 : vector<256xf32> to vector<1x256xf32>
    %cst_4 = arith.constant 3.200000e+01 : f32
    %11 = vector.broadcast %cst_4 : f32 to vector<1x256xf32>
    %12 = arith.divf %10, %11 : vector<1x256xf32>
    %cst_5 = arith.constant 9.99999974E-6 : f32
    %13 = vector.broadcast %cst_5 : f32 to vector<1x256xf32>
    %14 = arith.addf %12, %13 : vector<1x256xf32>
    %15 = math.rsqrt %14 : vector<1x256xf32>
    %16 = vector.broadcast %15 : vector<1x256xf32> to vector<32x256xf32>
    %17 = arith.mulf %7, %16 : vector<32x256xf32>
    %c0_6 = arith.constant 0 : index
    %c0_7 = arith.constant 0 : index
    %18 = vector.load %arg3[%c0_6, %c0_7] : memref<128x32xbf16, #tpu.memory_space<vmem>>, vector<128x32xbf16>
    %19 = arith.truncf %17 : vector<32x256xf32> to vector<32x256xbf16>
    %cst_8 = arith.constant dense<0.000000e+00> : vector<128x256xf32>
    %20 = tpu.matmul %18, %19, %cst_8 {dimension_numbers = #tpu.dot_dimension_numbers<[1], [0], [0], [1], [0, 0, 1, 1], [], []>} : vector<128x32xbf16>, vector<32x256xbf16>, vector<128x256xf32> -> vector<128x256xf32>
    %21 = arith.truncf %20 : vector<128x256xf32> to vector<128x256xbf16>
    %c0_9 = arith.constant 0 : index
    %c0_10 = arith.constant 0 : index
    %22 = vector.load %arg4[%c0_9, %c0_10] : memref<128x1xbf16, #tpu.memory_space<vmem>>, vector<128x1xbf16>
    %23 = vector.broadcast %22 : vector<128x1xbf16> to vector<128x256xbf16>
    %24 = arith.addf %21, %23 : vector<128x256xbf16>
    %cst_11 = arith.constant 7.968750e-01 : bf16
    %25 = vector.broadcast %cst_11 : bf16 to vector<128x256xbf16>
    %26 = arith.mulf %25, %24 : vector<128x256xbf16>
    %27 = arith.mulf %24, %24 : vector<128x256xbf16>
    %cst_12 = arith.constant 4.467770e-02 : bf16
    %28 = vector.broadcast %cst_12 : bf16 to vector<128x256xbf16>
    %29 = arith.mulf %28, %27 : vector<128x256xbf16>
    %cst_13 = arith.constant 1.000000e+00 : bf16
    %30 = vector.broadcast %cst_13 : bf16 to vector<128x256xbf16>
    %31 = arith.addf %30, %29 : vector<128x256xbf16>
    %32 = arith.mulf %26, %31 : vector<128x256xbf16>
    %cst_14 = arith.constant 5.000000e-01 : bf16
    %33 = vector.broadcast %cst_14 : bf16 to vector<128x256xbf16>
    %34 = arith.mulf %33, %24 : vector<128x256xbf16>
    %35 = math.tanh %32 : vector<128x256xbf16>
    %cst_15 = arith.constant 1.000000e+00 : bf16
    %36 = vector.broadcast %cst_15 : bf16 to vector<128x256xbf16>
    %37 = arith.addf %36, %35 : vector<128x256xbf16>
    %38 = arith.mulf %34, %37 : vector<128x256xbf16>
    %c0_16 = arith.constant 0 : index
    %c0_17 = arith.constant 0 : index
    %39 = vector.load %arg5[%c0_16, %c0_17] : memref<32x128xbf16, #tpu.memory_space<vmem>>, vector<32x128xbf16>
    %cst_18 = arith.constant dense<0.000000e+00> : vector<32x256xf32>
    %40 = tpu.matmul %39, %38, %cst_18 {dimension_numbers = #tpu.dot_dimension_numbers<[1], [0], [0], [1], [0, 0, 1, 1], [], []>} : vector<32x128xbf16>, vector<128x256xbf16>, vector<32x256xf32> -> vector<32x256xf32>
    %c0_19 = arith.constant 0 : index
    %c0_20 = arith.constant 0 : index
    %41 = vector.load %arg6[%c0_19, %c0_20] : memref<32x1xf32, #tpu.memory_space<vmem>>, vector<32x1xf32>
    %42 = vector.broadcast %41 : vector<32x1xf32> to vector<32x256xf32>
    %43 = arith.addf %40, %42 : vector<32x256xf32>
    %c0_21 = arith.constant 0 : index
    %c0_22 = arith.constant 0 : index
    %c0_23 = arith.constant 0 : index
    %44 = vector.load %arg7[%c0_21, %c0_22, %c0_23] : memref<1x32x256xf32, #tpu.memory_space<vmem>>, vector<1x32x256xf32>
    %45 = vector.shape_cast %44 : vector<1x32x256xf32> to vector<32x256xf32>
    %46 = vector.shape_cast %43 : vector<32x256xf32> to vector<1x32x256xf32>
    tpu.vector_store %arg7[%c0_21, %c0_22, %c0_23], %46 {strides = array<i32>} : memref<1x32x256xf32, #tpu.memory_space<vmem>>, vector<1x32x256xf32>,
    return
  }
  func.func @transform_0(%arg0: i32, %arg1: i32) -> (i32, i32, i32) {
    %c0_i32 = arith.constant 0 : i32
    %c0_i32_0 = arith.constant 0 : i32
    return %arg0, %c0_i32, %arg1 : i32, i32, i32
  }
  func.func @transform_1(%arg0: i32, %arg1: i32) -> (i32, i32) {
    %c0_i32 = arith.constant 0 : i32
    %c0_i32_0 = arith.constant 0 : i32
    %c0_i32_1 = arith.constant 0 : i32
    return %c0_i32, %c0_i32_0 : i32, i32
  }
  func.func @transform_2(%arg0: i32, %arg1: i32) -> (i32, i32) {
    %c0_i32 = arith.constant 0 : i32
    %c0_i32_0 = arith.constant 0 : i32
    %c0_i32_1 = arith.constant 0 : i32
    return %c0_i32, %c0_i32_0 : i32, i32
  }
  func.func @transform_3(%arg0: i32, %arg1: i32) -> (i32, i32) {
    %c0_i32 = arith.constant 0 : i32
    %c0_i32_0 = arith.constant 0 : i32
    %c0_i32_1 = arith.constant 0 : i32
    return %c0_i32, %c0_i32_0 : i32, i32
  }
  func.func @transform_4(%arg0: i32, %arg1: i32) -> (i32, i32) {
    %c0_i32 = arith.constant 0 : i32
    %c0_i32_0 = arith.constant 0 : i32
    %c0_i32_1 = arith.constant 0 : i32
    return %c0_i32, %c0_i32_0 : i32, i32
  }
  func.func @transform_5(%arg0: i32, %arg1: i32) -> (i32, i32, i32) {
    %c0_i32 = arith.constant 0 : i32
    %c0_i32_0 = arith.constant 0 : i32
    return %arg0, %c0_i32, %arg1 : i32, i32, i32
  }
}

</mosaic_0001>

<bundles_post_ra>
// kernel: feed_forward.1
= control target key start
LH: loop header
LB: loop body
LE: loop exit
PB: predicated region body
PF: predicated region fallthrough
CT: control target
= control target key end

     0   :  { %s1333_s18 = smov 0   ;;  %s1335_s19 = smov 0   ;;  %s1625_s0 = inlined_call_operand.vmem [shape: f32[2,32,256], index: 0, kind: input, shape index: {}]   ;;  %s1626_s1 = inlined_call_operand.vmem [shape: bf16[128,32], index: 1, kind: input, shape index: {}]   ;;  %s1627_s2 = inlined_call_operand.vmem [shape: bf16[128,1], index: 2, kind: input, shape index: {}]   ;;  %s1628_s3 = inlined_call_operand.vmem [shape: bf16[32,128], index: 3, kind: input, shape index: {}]   ;;  %s1629_s4 = inlined_call_operand.vmem [shape: f32[32,1], index: 4, kind: input, shape index: {}]   ;;  %s1630_s5 = inlined_call_operand.vmem [shape: f32[2,32,256], index: 5, kind: output, shape index: {}]  }
   0x1   :  { %s1337_s20 = smov 0  }
   0x2 LB: > { %s27_s21 = sadd.s32 1, %s1295_s19  ;;  %p1168_p0 = scmp.ge.s32.totalorder %s1299_s20, 1  ;;  %s1299_s20 = sphi %s1337_s20, %s15_s20   ;;  %s1295_s19 = sphi %s1335_s19, %s1632_s19   ;;  %s1291_s18 = sphi %s1333_s18, %s1631_s18  }
   0x3   : > { %p29_p1 = scmp.ge.s32.totalorder %s27_s21, 2  ;;  %p208_p2 = scmp.lt.s32.totalorder %s1299_s20, 3 }
   0x5   : > { %s1634_s21 = smov (%p29_p1, %s27_s21), 0  ;;  %p209_p3 = pnand %p1168_p0, %p208_p2 }
   0x6   : > { %p245_p4 = scmp.lt.s32.totalorder (!%p209_p3), %s1291_s18, 1  ;;  %v1301_v0 = vmov (!%p209_p3), 0   ;;  %v560_v14 = vld [vmem:[%s1627_s2] sm:$0xf] (!%p209_p3)  ;;  %v562_v15 = vld [vmem:[%s1627_s2 + $0x8] sm:$0xf] (!%p209_p3) }
   0x7   : > { %212 = sbr.rel (%p209_p3) target bundleno = 616 (0x268), region = 40  ;;  %463 = vmatprep.mubr.bf16.mxu0 (!%p209_p3), %v1301_v0  ;;  %1229 = vset.pattern.permute.xlu0 (!%p209_p3), %v1301_v0  ;;  %v561_v18 = vld [vmem:[%s1627_s2 + $0x4] sm:$0xf] (!%p209_p3)  ;;  %v563_v19 = vld [vmem:[%s1627_s2 + $0xc] sm:$0xf] (!%p209_p3)  ;;  %vm406_vm0 = vcmask (!%p209_p3), 261120  }
   0x8   : > { %1230 = vset.pattern.permute.xlu1 (!%p209_p3), %v1301_v0  ;;  %1048 = vmatprep.mubr.bf16.mxu1 (!%p209_p3), %v1301_v0  ;;  %v564_v23 = vld [vmem:[%s1627_s2 + $0x10] sm:$0xf] (!%p209_p3)  ;;  %v565_v25 = vld [vmem:[%s1627_s2 + $0x14] sm:$0xf] (!%p209_p3)  ;;  %v566_v30 = vld [vmem:[%s1627_s2 + $0x18] sm:$0xf] (!%p209_p3) }
   0x9   : > { %578 = vperm.xlu0 (!%p209_p3), %1229, %v560_v14   ;;  %602 = vperm.xlu1 (!%p209_p3), %1230, %v562_v15   ;;  %v567_v31 = vld [vmem:[%s1627_s2 + $0x1c] sm:$0xf] (!%p209_p3)  ;;  %v568_v36 = vld [vmem:[%s1627_s2 + $0x20] sm:$0xf] (!%p209_p3)  ;;  %v569_v38 = vld [vmem:[%s1627_s2 + $0x24] sm:$0xf] (!%p209_p3) }
   0xa   : > { %v570_v50 = vld [vmem:[%s1627_s2 + $0x28] sm:$0xf] (!%p209_p3)  ;;  %v571_v54 = vld [vmem:[%s1627_s2 + $0x2c] sm:$0xf] (!%p209_p3)  ;;  %v572_v60 = vld [vmem:[%s1627_s2 + $0x30] sm:$0xf] (!%p209_p3) }
   0xb   : > { %v573_v62 = vld [vmem:[%s1627_s2 + $0x34] sm:$0xf] (!%p209_p3) }
   0xc   : > { %v982_v15 = vld [vmem:[%s1629_s4 + $0x10] sm:$0xff] (!%p209_p3) }
   0xd   : > { %590 = vperm.xlu0 (!%p209_p3), %1229, %v561_v18   ;;  %614 = vperm.xlu1 (!%p209_p3), %1230, %v563_v19  }
   0xe   : > { %s1636_s18 = smov (!%p245_p4, %s1291_s18), 1 }
   0xf   : > { %s1201_s22 = sshll.u32 %s1636_s18, 6 }
  0x10   : > { %s252_s25 = scalar_lea.vmem %s1625_s0, %s1201_s22  ;;  %s262_s28 = scalar_lea.vmem %s1630_s5, %s1201_s22 }
  0x11   : > { %v270_v1 = vld [vmem:[%s252_s25 + $0x8] sm:$0xff]  ;;  %v272_v2 = vld [vmem:[%s252_s25 + $0x18] sm:$0xff]  ;;  %v269_v5 = vld [vmem:[%s252_s25] sm:$0xff]  ;;  %626 = vperm.xlu0 %1229, %v564_v23   ;;  %638 = vperm.xlu1 %1230, %v565_v25  }
  0x12   : > { %v274_v3 = vld [vmem:[%s252_s25 + $0x28] sm:$0xff]  ;;  %v286_v4 = vadd.f32 %v272_v2, %v270_v1  ;;  %v271_v6 = vld [vmem:[%s252_s25 + $0x10] sm:$0xff]  ;;  %v276_v7 = vld [vmem:[%s252_s25 + $0x38] sm:$0xff] }
  0x13   : > { %v273_v8 = vld [vmem:[%s252_s25 + $0x20] sm:$0xff]  ;;  %v277_v9 = vadd.f32 %v271_v6, %v269_v5  ;;  %v275_v11 = vld [vmem:[%s252_s25 + $0x30] sm:$0xff] }
  0x14   : > { %v287_v10 = vadd.f32 %v286_v4, %v274_v3 }
  0x15   : > { %v278_v12 = vadd.f32 %v277_v9, %v273_v8  ;;  %650 = vperm.xlu0 %1229, %v566_v30   ;;  %662 = vperm.xlu1 %1230, %v567_v31   ;;  %v980_v9 = vld [vmem:[%s1629_s4] sm:$0xff] }
  0x16   : > { %v288_v13 = vadd.f32 %v287_v10, %v276_v7 }
  0x17   : > { %v279_v16 = vadd.f32 %v278_v12, %v275_v11 }
  0x18   : > { %v289_v17 = vrot.slane %v288_v13, 4 }
  0x19   : > { %v280_v20 = vrot.slane %v279_v16, 4  ;;  %674 = vperm.xlu0 %1229, %v568_v36   ;;  %686 = vperm.xlu1 %1230, %v569_v38   ;;  %v1231_v38 = vld [vmem:[%s1626_s1] sm:$0xff]  }
  0x1a   : > { %v290_v21 = vadd.f32 %v289_v17, %v288_v13  ;;  %v983_v17 = vld [vmem:[%s1629_s4 + $0x18] sm:$0xff] }
  0x1b   : > { %v281_v22 = vadd.f32 %v280_v20, %v279_v16 }
  0x1c   : > { %v291_v24 = vrot.slane %v290_v21, 2 }
  0x1d   : > { %v282_v26 = vrot.slane %v281_v22, 2  ;;  %698 = vperm.xlu0 %1229, %v570_v50   ;;  %710 = vperm.xlu1 %1230, %v571_v54  }
  0x1e   : > { %v292_v27 = vadd.f32 %v291_v24, %v290_v21 }
  0x1f   : > { %v283_v28 = vadd.f32 %v282_v26, %v281_v22 }
  0x20   : > { %v293_v29 = vrot.slane %v292_v27, 1 }
  0x21   : > { %v284_v32 = vrot.slane %v283_v28, 1  ;;  %722 = vperm.xlu0 %1229, %v572_v60   ;;  %734 = vperm.xlu1 %1230, %v573_v62  }
  0x22   : > { %v294_v33 = vadd.f32 %v293_v29, %v292_v27 }
  0x23   : > { %v285_v34 = vadd.f32 %v284_v32, %v283_v28 }
  0x24   : > { %v297_v35 = vmul.f32 0.03125, %v294_v33 }
  0x25   : > { %v296_v37 = vmul.f32 0.03125, %v285_v34 }
  0x26   : > { %v1393_v39 = vsub.f32 %v270_v1, %v297_v35  ;;  %v1395_v40 = vsub.f32 %v272_v2, %v297_v35  ;;  %v1397_v41 = vsub.f32 %v274_v3, %v297_v35  ;;  %v1399_v42 = vsub.f32 %v276_v7, %v297_v35  ;;  %v574_v3 = vld [vmem:[%s1627_s2 + $0x38] sm:$0xf] }
  0x27   : > { %v1401_v43 = vsub.f32 %v269_v5, %v296_v37  ;;  %v1403_v44 = vsub.f32 %v271_v6, %v296_v37  ;;  %v1405_v45 = vsub.f32 %v273_v8, %v296_v37  ;;  %v1407_v46 = vsub.f32 %v275_v11, %v296_v37  ;;  %v575_v5 = vld [vmem:[%s1627_s2 + $0x3c] sm:$0xf]  ;;  %746 = vperm.xlu0 %1229, %v574_v3   ;;  %v981_v11 = vld [vmem:[%s1629_s4 + $0x8] sm:$0xff] }
  0x28   : > { %v307_v47 = vmul.f32 %v1393_v39, %v1393_v39  ;;  %v309_v48 = vmul.f32 %v1395_v40, %v1395_v40  ;;  %v311_v49 = vmul.f32 %v1397_v41, %v1397_v41  ;;  %v313_v55 = vmul.f32 %v1399_v42, %v1399_v42  ;;  %758 = vperm.xlu1 %1230, %v575_v5  }
  0x29   : > { %v306_v51 = vmul.f32 %v1401_v43, %v1401_v43  ;;  %v308_v52 = vmul.f32 %v1403_v44, %v1403_v44  ;;  %v310_v53 = vmul.f32 %v1405_v45, %v1405_v45  ;;  %v312_v57 = vmul.f32 %v1407_v46, %v1407_v46 }
  0x2a   : > { %v323_v56 = vadd.f32 %v309_v48, %v307_v47  ;;  %v584_v48 = vlaneseq }
  0x2b   : > { %v314_v58 = vadd.f32 %v308_v52, %v306_v51  ;;  %986 = vperm.xlu0 %1229, %v980_v9  }
  0x2c   : > { %v324_v59 = vadd.f32 %v323_v56, %v311_v49  ;;  %991 = vperm.xlu1 %1230, %v981_v11   ;;  %v585_v50 = vshrl.u32 %v584_v48, 7 }
  0x2d   : > { %v315_v61 = vadd.f32 %v314_v58, %v310_v53 }
  0x2e   : > { %v325_v63 = vadd.f32 %v324_v59, %v313_v55 }
  0x2f   : > { %v316_v1 = vadd.f32 %v315_v61, %v312_v57  ;;  %996 = vperm.xlu0 %1229, %v982_v15  }
  0x30   : > { %v326_v2 = vrot.slane %v325_v63, 4  ;;  %1001 = vperm.xlu1 %1230, %v983_v17  }
  0x31   : > { %v317_v4 = vrot.slane %v316_v1, 4 }
  0x32   : > { %v327_v6 = vadd.f32 %v326_v2, %v325_v63 }
  0x33   : > { %v318_v7 = vadd.f32 %v317_v4, %v316_v1 }
  0x34   : > { %v328_v8 = vrot.slane %v327_v6, 2 }
  0x35   : > { %v319_v10 = vrot.slane %v318_v7, 2 }
  0x36   : > { %v329_v12 = vadd.f32 %v328_v8, %v327_v6 }
  0x37   : > { %v320_v13 = vadd.f32 %v319_v10, %v318_v7 }
  0x38   : > { %v330_v14 = vrot.slane %v329_v12, 1 }
  0x39   : > { %v321_v16 = vrot.slane %v320_v13, 1 }
  0x3a   : > { %v331_v18 = vadd.f32 %v330_v14, %v329_v12 }
  0x3b   : > { %v322_v19 = vadd.f32 %v321_v16, %v320_v13 }
  0x3c   : > { %v333_v20 = vmul.f32 0.03125, %v331_v18 }
  0x3d   : > { %v332_v21 = vmul.f32 0.03125, %v322_v19 }
  0x3e   : > { %v335_v22 = vadd.f32 1e-05, %v333_v20 }
  0x3f   : > { %v334_v23 = vadd.f32 1e-05, %v332_v21 }
  0x40   : > { %1241 = vrsqrt.f32 %v335_v22 }
  0x41   : > { %1243 = vrsqrt.f32 %v334_v23 }
  0x4a   : > { %v1242_v24 = vpop.eup %1241 }
  0x4b   : > { %v1244_v25 = vpop.eup %1243  ;;  %v339_v26 = vmul.f32 %v1242_v24, %v1393_v39  ;;  %v341_v27 = vmul.f32 %v1242_v24, %v1395_v40  ;;  %v343_v28 = vmul.f32 %v1242_v24, %v1397_v41  ;;  %v345_v29 = vmul.f32 %v1242_v24, %v1399_v42  ;;  %v1232_v39 = vld [vmem:[%s1626_s1 + $0x8] sm:$0xff]   ;;  %v1233_v40 = vld [vmem:[%s1626_s1 + $0x10] sm:$0xff]   ;;  %v1234_v41 = vld [vmem:[%s1626_s1 + $0x18] sm:$0xff]  }
  0x4c   : > { %v338_v30 = vmul.f32 %v1244_v25, %v1401_v43  ;;  %v340_v31 = vmul.f32 %v1244_v25, %v1403_v44  ;;  %v342_v32 = vmul.f32 %v1244_v25, %v1405_v45  ;;  %v344_v33 = vmul.f32 %v1244_v25, %v1407_v46  ;;  %v1235_v42 = vld [vmem:[%s1626_s1 + $0x20] sm:$0xff]   ;;  %v1236_v43 = vld [vmem:[%s1626_s1 + $0x28] sm:$0xff]   ;;  %v1237_v44 = vld [vmem:[%s1626_s1 + $0x30] sm:$0xff]  }
  0x4d   : > { %v363_v34 = vpack.c.bf16 %v341_v27, %v339_v26  ;;  %v365_v35 = vpack.c.bf16 %v345_v29, %v343_v28  ;;  %v1238_v45 = vld [vmem:[%s1626_s1 + $0x38] sm:$0xff]   ;;  %v1302_v46 = vmov 839922192  }
  0x4e   : > { %v362_v36 = vpack.c.bf16 %v340_v31, %v338_v30  ;;  %v364_v37 = vpack.c.bf16 %v344_v33, %v342_v32  ;;  %v582_v47 = vunpack.c.l.s4 %v1302_v46 }
  0x4f   : > { %431 = vmatprep.subr.bf16.mxu0 %v363_v34 }
  0x50   : > { %432 = vmatpush1.bf16.msra.mxu0 %v362_v36  ;;  %v583_v49 = vunpack.c.0.s8 %v582_v47 }
  0x51   : > { %433 = vmatprep.subr.bf16.mxu0 %v365_v35 }
  0x52   : > { %v1502_v52 = vsub.s32 %v583_v49, %v585_v50 }
  0x54   : > { %434 = vmatpush1.bf16.msra.mxu0 %v364_v37 }
  0x57   : > { %1181 = vmatmul.mubr.msk.bf16.vlgmr.msra.gmra.mrb[0].mxu0 %vm406_vm0, %v1231_v38 }
  0x58   : > { %473 = vmatprep.mubr.bf16.mxu0 %v1301_v0 }
  0x5f   : > { %1182 = vmatmul.mubr.msk.bf16.gmra.mrb[4].mxu0 %vm406_vm0, %v1232_v39 }
  0x60   : > { %483 = vmatprep.mubr.bf16.mxu0 %v1301_v0 }
  0x67   : > { %1183 = vmatmul.mubr.msk.bf16.gmra.mrb[8].mxu0 %vm406_vm0, %v1233_v40 }
  0x68   : > { %493 = vmatprep.mubr.bf16.mxu0 %v1301_v0 }
  0x6f   : > { %1184 = vmatmul.mubr.msk.bf16.gmra.mrb[12].mxu0 %vm406_vm0, %v1234_v41 }
  0x70   : > { %503 = vmatprep.mubr.bf16.mxu0 %v1301_v0 }
  0x77   : > { %1185 = vmatmul.mubr.msk.bf16.gmra.mrb[16].mxu0 %vm406_vm0, %v1235_v42 }
  0x78   : > { %513 = vmatprep.mubr.bf16.mxu0 %v1301_v0 }
  0x7f   : > { %1186 = vmatmul.mubr.msk.bf16.gmra.mrb[20].mxu0 %vm406_vm0, %v1236_v43 }
  0x80   : > { %523 = vmatprep.mubr.bf16.mxu0 %v1301_v0 }
  0x87   : > { %1187 = vmatmul.mubr.msk.bf16.gmra.mrb[24].mxu0 %vm406_vm0, %v1237_v44 }
  0x88   : > { %533 = vmatprep.mubr.bf16.mxu0 %v1301_v0  ;;  %v579_v51 = vpop.permute.xlu0 %578  ;;  %v603_v56 = vpop.permute.xlu1 %602 }
  0x89   : > { %v587_v54 = vrot.slane %v579_v51, %v1502_v52  ;;  %v611_v2 = vrot.slane %v603_v56, %v1502_v52 }
  0x8c   : > { %v591_v53 = vpop.permute.xlu0 %590  ;;  %v615_v63 = vpop.permute.xlu1 %614 }
  0x8d   : > { %v599_v55 = vrot.slane %v591_v53, %v1502_v52  ;;  %v623_v3 = vrot.slane %v615_v63, %v1502_v52 }
  0x8f   : > { %1188 = vmatmul.mubr.msk.bf16.gmra.mrb[28].mxu0 %vm406_vm0, %v1238_v45  ;;  %v1189_v58 = vcombine.low %v587_v54, %v599_v55  ;;  %v1190_v9 = vcombine.low %v611_v2, %v623_v3 }
  0x90   : > { %v627_v18 = vpop.permute.xlu0 %626  ;;  %v639_v19 = vpop.permute.xlu1 %638 }
  0x91   : > { %v635_v23 = vrot.slane %v627_v18, %v1502_v52  ;;  %v647_v24 = vrot.slane %v639_v19, %v1502_v52 }
  0x93   : > { %v1191_v32 = vcombine.low %v635_v23, %v647_v24 }
  0x94   : > { %v651_v41 = vpop.permute.xlu0 %650  ;;  %v663_v42 = vpop.permute.xlu1 %662 }
  0x95   : > { %v659_v46 = vrot.slane %v651_v41, %v1502_v52  ;;  %v671_v47 = vrot.slane %v663_v42, %v1502_v52 }
  0x97   : > { %v1192_v56 = vcombine.low %v659_v46, %v671_v47 }
 0x12a   : > { %v465_v57 = vpop.f32.mrb[0].mxu0 }
 0x12b   : > { %v467_v59 = vpop.f32.mrb[1].mxu0 }
 0x12c   : > { %v469_v60 = vpop.f32.mrb[2].mxu0 }
 0x12d   : > { %v544_v61 = vpack.c.bf16 %v469_v60, %v465_v57  ;;  %v471_v62 = vpop.f32.mrb[3].mxu0 }
 0x12e   : > { %v545_v1 = vpack.c.bf16 %v471_v62, %v467_v59 }
 0x12f   : > { %v1508_v4 = vadd.bf16 %v1189_v58, %v544_v61 }
 0x130   : > { %v1510_v5 = vadd.bf16 %v1189_v58, %v545_v1 }
 0x131   : > { %v848_v6 = vmul.bf16 %v1508_v4, %v1508_v4  ;;  %v832_v14 = vmul.bf16 1061961548, %v1508_v4 }
 0x132   : > { %v849_v7 = vmul.bf16 %v1510_v5, %v1510_v5  ;;  %v475_v8 = vpop.f32.mrb[4].mxu0  ;;  %v833_v20 = vmul.bf16 1061961548, %v1510_v5  ;;  %v913_v59 = vmul.bf16 1056980736, %v1510_v5 }
 0x133   : > { %v864_v10 = vmul.bf16 1027030327, %v848_v6  ;;  %v477_v11 = vpop.f32.mrb[5].mxu0  ;;  %v912_v5 = vmul.bf16 1056980736, %v1508_v4 }
 0x134   : > { %v865_v12 = vmul.bf16 1027030327, %v849_v7  ;;  %v479_v13 = vpop.f32.mrb[6].mxu0 }
 0x135   : > { %v880_v15 = vadd.bf16 1065369472, %v864_v10  ;;  %v546_v16 = vpack.c.bf16 %v479_v13, %v475_v8  ;;  %v481_v17 = vpop.f32.mrb[7].mxu0 }
 0x136   : > { %v547_v21 = vpack.c.bf16 %v481_v17, %v477_v11  ;;  %v881_v22 = vadd.bf16 1065369472, %v865_v12  ;;  %v675_v12 = vpop.permute.xlu0 %674 }
 0x137   : > { %v1520_v25 = vadd.bf16 %v1190_v9, %v546_v16  ;;  %v896_v26 = vmul.bf16 %v880_v15, %v832_v14  ;;  %v683_v15 = vrot.slane %v675_v12, %v1502_v52  ;;  %v687_v16 = vpop.permute.xlu1 %686 }
 0x138   : > { %v1522_v27 = vadd.bf16 %v1190_v9, %v547_v21  ;;  %v897_v28 = vmul.bf16 %v881_v22, %v833_v20  ;;  %v695_v20 = vrot.slane %v687_v16, %v1502_v52 }
 0x139   : > { %v850_v29 = vmul.bf16 %v1520_v25, %v1520_v25  ;;  %1245 = vtanh.bf16 %v896_v26  ;;  %v834_v37 = vmul.bf16 1061961548, %v1520_v25 }
 0x13a   : > { %v851_v30 = vmul.bf16 %v1522_v27, %v1522_v27  ;;  %v485_v31 = vpop.f32.mrb[8].mxu0  ;;  %1247 = vtanh.bf16 %v897_v28  ;;  %v835_v43 = vmul.bf16 1061961548, %v1522_v27  ;;  %v915_v28 = vmul.bf16 1056980736, %v1522_v27 }
 0x13b   : > { %v866_v33 = vmul.bf16 1027030327, %v850_v29  ;;  %v487_v34 = vpop.f32.mrb[9].mxu0  ;;  %v914_v27 = vmul.bf16 1056980736, %v1520_v25  ;;  %v711_v47 = vpop.permute.xlu1 %710 }
 0x13c   : > { %v867_v35 = vmul.bf16 1027030327, %v851_v30  ;;  %v489_v36 = vpop.f32.mrb[10].mxu0 }
 0x13d   : > { %v882_v38 = vadd.bf16 1065369472, %v866_v33  ;;  %v548_v39 = vpack.c.bf16 %v489_v36, %v485_v31  ;;  %v491_v40 = vpop.f32.mrb[11].mxu0 }
 0x13e   : > { %v883_v44 = vadd.bf16 1065369472, %v867_v35  ;;  %v549_v45 = vpack.c.bf16 %v491_v40, %v487_v34  ;;  %v1193_v34 = vcombine.low %v683_v15, %v695_v20 }
 0x13f   : > { %v898_v48 = vmul.bf16 %v882_v38, %v834_v37  ;;  %v1532_v49 = vadd.bf16 %v1191_v32, %v548_v39 }
 0x140   : > { %v899_v50 = vmul.bf16 %v883_v44, %v835_v43  ;;  %v1534_v51 = vadd.bf16 %v1191_v32, %v549_v45  ;;  %v699_v43 = vpop.permute.xlu0 %698 }
 0x141   : > { %v852_v53 = vmul.bf16 %v1532_v49, %v1532_v49  ;;  %1249 = vtanh.bf16 %v898_v48  ;;  %v836_v61 = vmul.bf16 1061961548, %v1532_v49  ;;  %v707_v46 = vrot.slane %v699_v43, %v1502_v52 }
 0x142   : > { %v853_v54 = vmul.bf16 %v1534_v51, %v1534_v51  ;;  %v495_v55 = vpop.f32.mrb[12].mxu0  ;;  %1251 = vtanh.bf16 %v899_v50  ;;  %v837_v8 = vmul.bf16 1061961548, %v1534_v51 }
 0x143   : > { %v868_v57 = vmul.bf16 1027030327, %v852_v53  ;;  %v497_v58 = vpop.f32.mrb[13].mxu0 }
 0x144   : > { %v1246_v60 = vpop.eup %1245  ;;  %v869_v62 = vmul.bf16 1027030327, %v853_v54  ;;  %v499_v63 = vpop.f32.mrb[14].mxu0  ;;  %v719_v54 = vrot.slane %v711_v47, %v1502_v52 }
 0x145   : > { %v1248_v1 = vpop.eup %1247  ;;  %v884_v2 = vadd.bf16 1065369472, %v868_v57  ;;  %v550_v3 = vpack.c.bf16 %v499_v63, %v495_v55  ;;  %v501_v6 = vpop.f32.mrb[15].mxu0  ;;  %v944_v7 = vadd.bf16 1065369472, %v1246_v60 }
 0x146   : > { %v885_v9 = vadd.bf16 1065369472, %v869_v62  ;;  %v551_v10 = vpack.c.bf16 %v501_v6, %v497_v58  ;;  %v945_v11 = vadd.bf16 1065369472, %v1248_v1  ;;  %v917_v60 = vmul.bf16 1056980736, %v1534_v51 }
 0x147   : > { %v900_v13 = vmul.bf16 %v884_v2, %v836_v61  ;;  %v1543_v14 = vadd.bf16 %v1192_v56, %v550_v3  ;;  %v960_v22 = vmul.bf16 %v944_v7, %v912_v5  ;;  %v1194_v3 = vcombine.low %v707_v46, %v719_v54  ;;  %v723_v5 = vpop.permute.xlu0 %722 }
 0x148   : > { %v901_v17 = vmul.bf16 %v885_v9, %v837_v8  ;;  %v1547_v18 = vadd.bf16 %v1192_v56, %v551_v10  ;;  %v961_v19 = vmul.bf16 %v945_v11, %v913_v59  ;;  %v916_v51 = vmul.bf16 1056980736, %v1532_v49 }
 0x149   : > { %v854_v21 = vmul.bf16 %v1543_v14, %v1543_v14  ;;  %1253 = vtanh.bf16 %v900_v13  ;;  %v838_v30 = vmul.bf16 1061961548, %v1543_v14 }
 0x14a   : > { %v855_v23 = vmul.bf16 %v1547_v18, %v1547_v18  ;;  %v505_v24 = vpop.f32.mrb[16].mxu0  ;;  %1016 = vmatprep.subr.bf16.mxu1 %v961_v19  ;;  %1255 = vtanh.bf16 %v901_v17  ;;  %v839_v39 = vmul.bf16 1061961548, %v1547_v18  ;;  %v731_v17 = vrot.slane %v723_v5, %v1502_v52  ;;  %v735_v19 = vpop.permute.xlu1 %734 }
 0x14b   : > { %v870_v4 = vmul.bf16 1027030327, %v854_v21  ;;  %v507_v26 = vpop.f32.mrb[17].mxu0  ;;  %1017 = vmatpush1.bf16.msra.mxu1 %v960_v22 }
 0x14c   : > { %v1250_v29 = vpop.eup %1249  ;;  %v871_v31 = vmul.bf16 1027030327, %v855_v23  ;;  %v509_v32 = vpop.f32.mrb[18].mxu0  ;;  %v743_v23 = vrot.slane %v735_v19, %v1502_v52 }
 0x14d   : > { %v1252_v33 = vpop.eup %1251  ;;  %v886_v35 = vadd.bf16 1065369472, %v870_v4  ;;  %v552_v36 = vpack.c.bf16 %v509_v32, %v505_v24  ;;  %v511_v37 = vpop.f32.mrb[19].mxu0  ;;  %v946_v38 = vadd.bf16 1065369472, %v1250_v29 }
 0x14e   : > { %v887_v40 = vadd.bf16 1065369472, %v871_v31  ;;  %v553_v41 = vpack.c.bf16 %v511_v37, %v507_v26  ;;  %v947_v42 = vadd.bf16 1065369472, %v1252_v33 }
 0x14f   : > { %v902_v44 = vmul.bf16 %v886_v35, %v838_v30  ;;  %v1557_v45 = vadd.bf16 %v1193_v34, %v552_v36  ;;  %v962_v56 = vmul.bf16 %v946_v38, %v914_v27  ;;  %v919_v30 = vmul.bf16 1056980736, %v1547_v18  ;;  %v747_v27 = vpop.permute.xlu0 %746 }
 0x150   : > { %v903_v48 = vmul.bf16 %v887_v40, %v839_v39  ;;  %v1561_v50 = vadd.bf16 %v1193_v34, %v553_v41  ;;  %v963_v53 = vmul.bf16 %v947_v42, %v915_v28  ;;  %v1195_v36 = vcombine.low %v731_v17, %v743_v23 }
 0x151   : > { %v856_v55 = vmul.bf16 %v1557_v45, %v1557_v45  ;;  %1257 = vtanh.bf16 %v902_v44  ;;  %v840_v62 = vmul.bf16 1061961548, %v1557_v45  ;;  %v918_v18 = vmul.bf16 1056980736, %v1543_v14 }
 0x152   : > { %v857_v57 = vmul.bf16 %v1561_v50, %v1561_v50  ;;  %v515_v58 = vpop.f32.mrb[20].mxu0  ;;  %1018 = vmatprep.subr.bf16.mxu1 %v963_v53  ;;  %1259 = vtanh.bf16 %v903_v48  ;;  %v841_v10 = vmul.bf16 1061961548, %v1561_v50  ;;  %v755_v48 = vrot.slane %v747_v27, %v1502_v52  ;;  %v759_v53 = vpop.permute.xlu1 %758 }
 0x153   : > { %v872_v25 = vmul.bf16 1027030327, %v856_v55  ;;  %v517_v59 = vpop.f32.mrb[21].mxu0  ;;  %1019 = vmatpush1.bf16.msra.mxu1 %v962_v56 }
 0x154   : > { %v1254_v61 = vpop.eup %1253  ;;  %v873_v63 = vmul.bf16 1027030327, %v857_v57  ;;  %v519_v1 = vpop.f32.mrb[22].mxu0  ;;  %v767_v57 = vrot.slane %v759_v53, %v1502_v52 }
 0x155   : > { %v1256_v2 = vpop.eup %1255  ;;  %v888_v6 = vadd.bf16 1065369472, %v872_v25  ;;  %v554_v7 = vpack.c.bf16 %v519_v1, %v515_v58  ;;  %v521_v8 = vpop.f32.mrb[23].mxu0  ;;  %v948_v9 = vadd.bf16 1065369472, %v1254_v61 }
 0x156   : > { %v889_v11 = vadd.bf16 1065369472, %v873_v63  ;;  %v555_v12 = vpack.c.bf16 %v521_v8, %v517_v59  ;;  %v949_v13 = vadd.bf16 1065369472, %v1256_v2 }
 0x157   : > { %v904_v15 = vmul.bf16 %v888_v6, %v840_v62  ;;  %v1571_v16 = vadd.bf16 %v1194_v3, %v554_v7  ;;  %v964_v4 = vmul.bf16 %v948_v9, %v916_v51  ;;  %v921_v62 = vmul.bf16 1056980736, %v1561_v50 }
 0x158   : > { %v905_v20 = vmul.bf16 %v889_v11, %v841_v10  ;;  %v1575_v21 = vadd.bf16 %v1194_v3, %v555_v12  ;;  %v965_v22 = vmul.bf16 %v949_v13, %v917_v60  ;;  %v1196_v6 = vcombine.low %v755_v48, %v767_v57 }
 0x159   : > { %v858_v24 = vmul.bf16 %v1571_v16, %v1571_v16  ;;  %1261 = vtanh.bf16 %v904_v15  ;;  %v842_v32 = vmul.bf16 1061961548, %v1571_v16  ;;  %v920_v50 = vmul.bf16 1056980736, %v1557_v45 }
 0x15a   : > { %v859_v26 = vmul.bf16 %v1575_v21, %v1575_v21  ;;  %v525_v28 = vpop.f32.mrb[24].mxu0  ;;  %1020 = vmatprep.subr.bf16.mxu1 %v965_v22  ;;  %1263 = vtanh.bf16 %v905_v20  ;;  %v843_v41 = vmul.bf16 1061961548, %v1575_v21 }
 0x15b   : > { %v874_v49 = vmul.bf16 1027030327, %v858_v24  ;;  %v527_v29 = vpop.f32.mrb[25].mxu0  ;;  %1021 = vmatpush1.bf16.msra.mxu1 %v964_v4 }
 0x15c   : > { %v1258_v31 = vpop.eup %1257  ;;  %v875_v33 = vmul.bf16 1027030327, %v859_v26  ;;  %v529_v34 = vpop.f32.mrb[26].mxu0 }
 0x15d   : > { %v1260_v35 = vpop.eup %1259  ;;  %v890_v37 = vadd.bf16 1065369472, %v874_v49  ;;  %v556_v38 = vpack.c.bf16 %v529_v34, %v525_v28  ;;  %v531_v39 = vpop.f32.mrb[27].mxu0  ;;  %v950_v40 = vadd.bf16 1065369472, %v1258_v31 }
 0x15e   : > { %v891_v42 = vadd.bf16 1065369472, %v875_v33  ;;  %v557_v43 = vpack.c.bf16 %v531_v39, %v527_v29  ;;  %v951_v44 = vadd.bf16 1065369472, %v1260_v35  ;;  %v923_v49 = vmul.bf16 1056980736, %v1575_v21 }
 0x15f   : > { %v906_v46 = vmul.bf16 %v890_v37, %v842_v32  ;;  %v1585_v47 = vadd.bf16 %v1195_v36, %v556_v38  ;;  %v966_v25 = vmul.bf16 %v950_v40, %v918_v18 }
 0x160   : > { %v907_v54 = vmul.bf16 %v891_v42, %v843_v41  ;;  %v1589_v55 = vadd.bf16 %v1195_v36, %v557_v43  ;;  %v967_v56 = vmul.bf16 %v951_v44, %v919_v30  ;;  %v922_v36 = vmul.bf16 1056980736, %v1571_v16 }
 0x161   : > { %v860_v58 = vmul.bf16 %v1585_v47, %v1585_v47  ;;  %1265 = vtanh.bf16 %v906_v46  ;;  %v844_v1 = vmul.bf16 1061961548, %v1585_v47  ;;  %v924_v44 = vmul.bf16 1056980736, %v1585_v47  ;;  %v1240_v47 = vld [vmem:[%s1628_s3 + $0x8] sm:$0xff]  }
 0x162   : > { %v861_v59 = vmul.bf16 %v1589_v55, %v1589_v55  ;;  %v535_v60 = vpop.f32.mrb[28].mxu0  ;;  %1022 = vmatprep.subr.bf16.mxu1 %v967_v56  ;;  %1267 = vtanh.bf16 %v907_v54  ;;  %v845_v11 = vmul.bf16 1061961548, %v1589_v55  ;;  %v925_v42 = vmul.bf16 1056980736, %v1589_v55  ;;  %v1239_v55 = vld [vmem:[%s1628_s3] sm:$0xff]  }
 0x163   : > { %v876_v14 = vmul.bf16 1027030327, %v860_v58  ;;  %v537_v61 = vpop.f32.mrb[29].mxu0  ;;  %1023 = vmatpush1.bf16.msra.mxu1 %v966_v25  ;;  %v987_v25 = vpop.permute.xlu0 %986 }
 0x164   : > { %v1262_v63 = vpop.eup %1261  ;;  %v877_v52 = vmul.bf16 1027030327, %v861_v59  ;;  %v539_v2 = vpop.f32.mrb[30].mxu0 }
 0x165   : > { %v1264_v3 = vpop.eup %1263  ;;  %v892_v7 = vadd.bf16 1065369472, %v876_v14  ;;  %v558_v8 = vpack.c.bf16 %v539_v2, %v535_v60  ;;  %v541_v9 = vpop.f32.mrb[31].mxu0  ;;  %v952_v10 = vadd.bf16 1065369472, %v1262_v63 }
 0x166   : > { %v893_v12 = vadd.bf16 1065369472, %v877_v52  ;;  %v559_v13 = vpack.c.bf16 %v541_v9, %v537_v61  ;;  %v953_v5 = vadd.bf16 1065369472, %v1264_v3  ;;  %v992_v61 = vpop.permute.xlu1 %991 }
 0x167   : > { %v908_v15 = vmul.bf16 %v892_v7, %v844_v1  ;;  %v830_v51 = vadd.bf16 %v1196_v6, %v558_v8  ;;  %v968_v23 = vmul.bf16 %v952_v10, %v920_v50  ;;  %v997_v2 = vpop.permute.xlu0 %996 }
 0x168   : > { %v909_v17 = vmul.bf16 %v893_v12, %v845_v11  ;;  %v831_v19 = vadd.bf16 %v1196_v6, %v559_v13  ;;  %v969_v20 = vmul.bf16 %v953_v5, %v921_v62 }
 0x169   : > { %v862_v22 = vmul.bf16 %v830_v51, %v830_v51  ;;  %1269 = vtanh.bf16 %v908_v15  ;;  %v846_v30 = vmul.bf16 1061961548, %v830_v51  ;;  %v926_v56 = vmul.bf16 1056980736, %v830_v51 }
 0x16a   : > { %v863_v24 = vmul.bf16 %v831_v19, %v831_v19  ;;  %1024 = vmatprep.subr.bf16.mxu1 %v969_v20  ;;  %1271 = vtanh.bf16 %v909_v17  ;;  %v847_v45 = vmul.bf16 1061961548, %v831_v19  ;;  %v927_v53 = vmul.bf16 1056980736, %v831_v19  ;;  %v1002_v8 = vpop.permute.xlu1 %1001 }
 0x16b   : > { %v878_v4 = vmul.bf16 1027030327, %v862_v22  ;;  %1025 = vmatpush1.bf16.msra.mxu1 %v968_v23 }
 0x16c   : > { %v1266_v26 = vpop.eup %1265  ;;  %v879_v28 = vmul.bf16 1027030327, %v863_v24 }
 0x16d   : > { %v1268_v29 = vpop.eup %1267  ;;  %v894_v31 = vadd.bf16 1065369472, %v878_v4  ;;  %v954_v32 = vadd.bf16 1065369472, %v1266_v26 }
 0x16e   : > { %v895_v33 = vadd.bf16 1065369472, %v879_v28  ;;  %v955_v34 = vadd.bf16 1065369472, %v1268_v29 }
 0x16f   : > { %v910_v35 = vmul.bf16 %v894_v31, %v846_v30  ;;  %v970_v39 = vmul.bf16 %v954_v32, %v922_v36 }
 0x170   : > { %v911_v37 = vmul.bf16 %v895_v33, %v847_v45  ;;  %v971_v38 = vmul.bf16 %v955_v34, %v923_v49 }
 0x171   : > { %1273 = vtanh.bf16 %v910_v35 }
 0x172   : > { %1026 = vmatprep.subr.bf16.mxu1 %v971_v38  ;;  %1275 = vtanh.bf16 %v911_v37 }
 0x173   : > { %1027 = vmatpush1.bf16.msra.mxu1 %v970_v39 }
 0x174   : > { %v1270_v40 = vpop.eup %1269 }
 0x175   : > { %v1272_v41 = vpop.eup %1271  ;;  %v956_v21 = vadd.bf16 1065369472, %v1270_v40 }
 0x176   : > { %v957_v43 = vadd.bf16 1065369472, %v1272_v41 }
 0x177   : > { %v972_v46 = vmul.bf16 %v956_v21, %v924_v44 }
 0x178   : > { %v973_v27 = vmul.bf16 %v957_v43, %v925_v42 }
 0x17a   : > { %1028 = vmatprep.subr.bf16.mxu1 %v973_v27 }
 0x17b   : > { %1029 = vmatpush1.bf16.msra.mxu1 %v972_v46 }
 0x17c   : > { %v1274_v16 = vpop.eup %1273 }
 0x17d   : > { %v1276_v18 = vpop.eup %1275  ;;  %v958_v48 = vadd.bf16 1065369472, %v1274_v16 }
 0x17e   : > { %v959_v54 = vadd.bf16 1065369472, %v1276_v18 }
 0x17f   : > { %v974_v58 = vmul.bf16 %v958_v48, %v926_v56 }
 0x180   : > { %v975_v57 = vmul.bf16 %v959_v54, %v927_v53 }
 0x182   : > { %1030 = vmatprep.subr.bf16.mxu1 %v975_v57 }
 0x183   : > { %1031 = vmatpush1.bf16.msra.mxu1 %v974_v58 }
 0x186   : > { %1049 = vmatmul.mubr.bf16.vlgmr.msra.gmra.mrb[0].mxu1 %v1239_v55 }
 0x187   : > { %1058 = vmatprep.mubr.bf16.mxu1 %v1301_v0 }
 0x18e   : > { %1059 = vmatmul.mubr.bf16.gmra.mrb[4].mxu1 %v1240_v47 }
 0x259   : > { %v1050_v59 = vpop.f32.mrb[0].mxu1 }
 0x25a   : > { %v1051_v60 = vadd.f32 %v1050_v59, %v987_v25  ;;  %v1052_v14 = vpop.f32.mrb[1].mxu1 }
 0x25b   : > { %v1053_v62 = vadd.f32 %v1052_v14, %v987_v25  ;;  %v1054_v63 = vpop.f32.mrb[2].mxu1 }
 0x25c   : > { %1069 = vst [vmem:[%s262_s28] sm:$0xff] %v1051_v60  ;;  %v1055_v1 = vadd.f32 %v1054_v63, %v992_v61  ;;  %v1056_v0 = vpop.f32.mrb[3].mxu1 }
 0x25d   : > { %1070 = vst [vmem:[%s262_s28 + $0x8] sm:$0xff] %v1053_v62  ;;  %v1057_v52 = vadd.f32 %v1056_v0, %v992_v61 }
 0x25e   : > { %1071 = vst [vmem:[%s262_s28 + $0x10] sm:$0xff] %v1055_v1 }
 0x25f   : > { %1072 = vst [vmem:[%s262_s28 + $0x18] sm:$0xff] %v1057_v52 }
 0x261   : > { %v1060_v3 = vpop.f32.mrb[4].mxu1 }
 0x262   : > { %v1061_v6 = vadd.f32 %v1060_v3, %v997_v2  ;;  %v1062_v7 = vpop.f32.mrb[5].mxu1 }
 0x263   : > { %v1063_v9 = vadd.f32 %v1062_v7, %v997_v2  ;;  %v1064_v10 = vpop.f32.mrb[6].mxu1 }
 0x264   : > { %1073 = vst [vmem:[%s262_s28 + $0x20] sm:$0xff] %v1061_v6  ;;  %v1065_v11 = vadd.f32 %v1064_v10, %v1002_v8  ;;  %v1066_v12 = vpop.f32.mrb[7].mxu1 }
 0x265   : > { %1074 = vst [vmem:[%s262_s28 + $0x28] sm:$0xff] %v1063_v9  ;;  %v1067_v13 = vadd.f32 %v1066_v12, %v1002_v8 }
 0x266   : > { %1075 = vst [vmem:[%s262_s28 + $0x30] sm:$0xff] %v1065_v11 }
 0x267   : > { %1076 = vst [vmem:[%s262_s28 + $0x38] sm:$0xff] %v1067_v13 }
 0x268 PF: > { %s15_s20 = sadd.s32 1, %s1299_s20   ;;  %s1631_s18 = smov %s1295_s19 }
 0x269   : > { %p12_p5 = scmp.ge.s32.totalorder %s15_s20, 4   ;;  %s1632_s19 = smov %s1634_s21 }
 0x26b   :  { %14 = sbr.rel (!%p12_p5) target bundleno = 2 (0x2), region = 70 }

</bundles_post_ra>
